<compile_context>
chip_gen: v7x
topology: tpu7x:2x2x1
jax: 0.10.0
libtpu: 0.0.40
codegen_flags: <defaults>
</compile_context>

<pallas_src>
import functools

import jax
import jax.numpy as jnp
from jax import lax
from jax.experimental import pallas as pl
from jax.experimental.pallas import tpu as pltpu

EPS = 1e-5
LANE = 128
_VMEM_LIMIT = 32 * 1024 * 1024   # safe on v5e / v6e / v7x


def _rup(x, m):
    return (x + m - 1) // m * m


# --------------------------- pass 1: conv1 + shortcut ------------------------

def _pass1_kernel(cols_ref, w_ref, b_ref, y_ref, st_ref, *, tl, l_valid):
    # One MXU matmul produces [conv1 | shortcut-1x1] side by side (2*C_p lanes).
    yy = jnp.dot(cols_ref[...], w_ref[...],
                 preferred_element_type=jnp.float32) + b_ref[...]
    y_ref[...] = yy

    # Per-tile partial BN statistics (padded rows l >= l_valid are masked out).
    j = pl.program_id(1)
    l_ids = j * tl + lax.broadcasted_iota(jnp.int32, (tl, 1), 0)
    ym = jnp.where(l_ids < l_valid, yy, 0.0)
    s = jnp.sum(ym, axis=0, keepdims=True)
    q = jnp.sum(ym * ym, axis=0, keepdims=True)
    st_ref[...] = jnp.concatenate([s, q], axis=0)


def _pass1(cols, w_comb, b_comb, *, n, g_l, tl, l_valid, c2p):
    lp = g_l * tl
    k1 = cols.shape[-1]
    kern = functools.partial(_pass1_kernel, tl=tl, l_valid=l_valid)
    return pl.pallas_call(
        kern,
        grid=(n, g_l),
        in_specs=[
            pl.BlockSpec((None, tl, k1), lambda i, j: (i, j, 0)),
            pl.BlockSpec((k1, c2p), lambda i, j: (0, 0)),
            pl.BlockSpec((1, c2p), lambda i, j: (0, 0)),
        ],
        out_specs=[
            pl.BlockSpec((None, tl, c2p), lambda i, j: (i, j, 0)),
            pl.BlockSpec((None, 2, c2p), lambda i, j: (i * g_l + j, 0, 0)),
        ],
        out_shape=[
            jax.ShapeDtypeStruct((n, lp, c2p), jnp.float32),
            jax.ShapeDtypeStruct((n * g_l, 2, c2p), jnp.float32),
        ],
        compiler_params=pltpu.CompilerParams(
            dimension_semantics=("parallel", "parallel"),
            vmem_limit_bytes=_VMEM_LIMIT),
    )(cols, w_comb, b_comb)


# ---------------------- pass 2: BN1 + ReLU + conv2 (fused) -------------------

def _pass2_kernel(y1_ref, a1_ref, c1_ref, w2_ref, b2_ref, y2_ref, st_ref,
                  *, lp, l_valid, c_p):
    # BN1 as precomputed affine (global stats), then ReLU.
    h = jnp.maximum(y1_ref[...] * a1_ref[...] + c1_ref[...], 0.0)

    # Rows l >= l_valid are length padding; zero them so they act exactly as
    # the conv2 zero-padding and stay out of the BN2 statistics.
    l_ids = lax.broadcasted_iota(jnp.int32, (lp, 1), 0)
    valid = l_ids < l_valid
    h = jnp.where(valid, h, 0.0)

    # conv2: one wide MXU matmul over all 3 taps (lane width 3*C_p), then
    # shifted adds -- no im2col in HBM.
    r = jnp.dot(h.astype(jnp.bfloat16), w2_ref[...],
                preferred_element_type=jnp.float32)            # (lp, 3*c_p)
    p0 = r[:, 0:c_p]            # tap k=0 -> contributes at output l = input+1
    p1 = r[:, c_p:2 * c_p]      # tap k=1 -> same position
    p2 = r[:, 2 * c_p:3 * c_p]  # tap k=2 -> contributes at output l = input-1

    zrow = jnp.zeros((1, c_p), jnp.float32)
    p0s = jnp.concatenate([zrow, p0[:lp - 1, :]], axis=0)      # p0[l-1]
    p2s = jnp.concatenate([p2[1:, :], zrow], axis=0)           # p2[l+1]
    y2 = p0s + p1 + p2s + b2_ref[...]
    y2_ref[...] = y2

    ym = jnp.where(valid, y2, 0.0)
    s = jnp.sum(ym, axis=0, keepdims=True)
    q = jnp.sum(ym * ym, axis=0, keepdims=True)
    st_ref[...] = jnp.concatenate([s, q], axis=0)


def _pass2(y1sc, a1, c1, w2_lanes, b2, *, n, lp, l_valid, c_p):
    # TODO(synk): for very long sequences, tile the L axis here with a 1-row
    # halo instead of loading the full (Lp, C_p) slab per batch element.
    kern = functools.partial(_pass2_kernel, lp=lp, l_valid=l_valid, c_p=c_p)
    return pl.pallas_call(
        kern,
        grid=(n,),
        in_specs=[
            pl.BlockSpec((None, lp, c_p), lambda i: (i, 0, 0)),  # conv1 half of y1sc
            pl.BlockSpec((1, c_p), lambda i: (0, 0)),
            pl.BlockSpec((1, c_p), lambda i: (0, 0)),
            pl.BlockSpec((c_p, 3 * c_p), lambda i: (0, 0)),
            pl.BlockSpec((1, c_p), lambda i: (0, 0)),
        ],
        out_specs=[
            pl.BlockSpec((None, lp, c_p), lambda i: (i, 0, 0)),
            pl.BlockSpec((None, 2, c_p), lambda i: (i, 0, 0)),
        ],
        out_shape=[
            jax.ShapeDtypeStruct((n, lp, c_p), jnp.float32),
            jax.ShapeDtypeStruct((n, 2, c_p), jnp.float32),
        ],
        compiler_params=pltpu.CompilerParams(
            dimension_semantics=("parallel",),
            vmem_limit_bytes=_VMEM_LIMIT),
    )(y1sc, a1, c1, w2_lanes, b2)


# -------------------- pass 3: BN2 + shortcut BN + add + ReLU -----------------

def _pass3_kernel(y2_ref, ysc_ref, a2_ref, asc_ref, cc_ref, out_ref):
    out_ref[...] = jnp.maximum(
        y2_ref[...] * a2_ref[...] + ysc_ref[...] * asc_ref[...] + cc_ref[...],
        0.0)


def _pass3(y2_flat, y1sc_flat, a2, asc, cc, *, rows, tm, c_p):
    return pl.pallas_call(
        _pass3_kernel,
        grid=(rows // tm,),
        in_specs=[
            pl.BlockSpec((tm, c_p), lambda i: (i, 0)),
            pl.BlockSpec((tm, c_p), lambda i: (i, 1)),   # shortcut half of y1sc
            pl.BlockSpec((1, c_p), lambda i: (0, 0)),
            pl.BlockSpec((1, c_p), lambda i: (0, 0)),
            pl.BlockSpec((1, c_p), lambda i: (0, 0)),
        ],
        out_specs=pl.BlockSpec((tm, c_p), lambda i: (i, 0)),
        out_shape=jax.ShapeDtypeStruct((rows, c_p), jnp.float32),
        compiler_params=pltpu.CompilerParams(
            dimension_semantics=("parallel",),
            vmem_limit_bytes=_VMEM_LIMIT),
    )(y2_flat, y1sc_flat, a2, asc, cc)


# --------------------------------- wrapper -----------------------------------

def residual_block_1d(x_ncl, params, stride):
    # TODO(synk): only the learnable-shortcut configuration (stride != 1 or
    # C_in != C_out) is implemented, matching the test configuration below.
    (w1, b1, g1, be1, w2, b2, g2, be2, wsc, bsc, gsc, besc) = params
    c_out = w1.shape[0]
    n, c_in, l = x_ncl.shape

    c_in_p = _rup(c_in, LANE)
    c_p = _rup(c_out, LANE)
    l_out = (l + 2 - 3) // stride + 1
    tl = min(512, _rup(l_out, 16))      # row tile: multiple of 16, capped
    lp = _rup(l_out, tl)
    g_l = lp // tl

    def padc(v):
        return jnp.zeros((c_p,), jnp.float32).at[:c_out].set(v)

    # ---------- host-side prep: im2col for conv1 + weight packing ----------
    x_nlc = jnp.transpose(x_ncl, (0, 2, 1))                       # (N, L, C_in)
    x_nlc = jnp.pad(x_nlc, ((0, 0), (0, 0), (0, c_in_p - c_in)))
    xp = jnp.pad(x_nlc, ((0, 0), (1, 1), (0, 0)))
    taps = [xp[:, k:k + stride * l_out:stride, :] for k in range(3)]
    cols1 = jnp.stack(taps, axis=2).reshape(n, l_out, 3 * c_in_p)
    cols1 = jnp.pad(cols1, ((0, 0), (0, lp - l_out), (0, 0))).astype(jnp.bfloat16)

    # Combined [conv1 | shortcut-1x1] weight: the shortcut input is exactly the
    # center tap of the conv1 im2col block (rows c_in_p : 2*c_in_p).
    w1_p = jnp.zeros((c_p, c_in_p, 3), jnp.float32).at[:c_out, :c_in, :].set(w1)
    w1m = jnp.transpose(w1_p, (2, 1, 0)).reshape(3 * c_in_p, c_p)
    wsc_m = jnp.zeros((c_in_p, c_p), jnp.float32).at[:c_in, :c_out].set(
        jnp.transpose(wsc[:, :, 0], (1, 0)))
    w_comb = jnp.zeros((3 * c_in_p, 2 * c_p), jnp.float32)
    w_comb = w_comb.at[:, :c_p].set(w1m)
    w_comb = w_comb.at[c_in_p:2 * c_in_p, c_p:].set(wsc_m)
    w_comb = w_comb.astype(jnp.bfloat16)
    b_comb = jnp.concatenate([padc(b1), padc(bsc)]).reshape(1, 2 * c_p)

    # ---------------- pass 1: conv1 + shortcut + partial stats --------------
    y1sc, st1 = _pass1(cols1, w_comb, b_comb, n=n, g_l=g_l, tl=tl,
                       l_valid=l_out, c2p=2 * c_p)

    m_rows = float(n * l_out)
    st1 = jnp.sum(st1, axis=0)                        # (2, 2*C_p)
    mean1 = st1[0] / m_rows
    var1 = jnp.maximum(st1[1] / m_rows - mean1 * mean1, 0.0)
    inv1 = lax.rsqrt(var1 + EPS)
    gam = jnp.concatenate([padc(g1), padc(gsc)])
    bet = jnp.concatenate([padc(be1), padc(besc)])
    scale1 = gam * inv1
    shift1 = bet - mean1 * scale1
    a1 = scale1[:c_p].reshape(1, c_p)
    c1 = shift1[:c_p].reshape(1, c_p)
    asc = scale1[c_p:].reshape(1, c_p)
    csc = shift1[c_p:].reshape(1, c_p)

    # ---------------- pass 2: BN1 + ReLU + conv2 (in-kernel taps) -----------
    w2_p = jnp.zeros((c_p, c_p, 3), jnp.float32).at[:c_out, :c_out, :].set(w2)
    w2_lanes = jnp.transpose(w2_p, (1, 2, 0)).reshape(c_p, 3 * c_p)
    w2_lanes = w2_lanes.astype(jnp.bfloat16)
    b2_p = padc(b2).reshape(1, c_p)
    y2, st2 = _pass2(y1sc, a1, c1, w2_lanes, b2_p, n=n, lp=lp,
                     l_valid=l_out, c_p=c_p)

    st2 = jnp.sum(st2, axis=0)
    mean2 = st2[0] / m_rows
    var2 = jnp.maximum(st2[1] / m_rows - mean2 * mean2, 0.0)
    inv2 = lax.rsqrt(var2 + EPS)
    a2 = (padc(g2) * inv2).reshape(1, c_p)
    c2 = (padc(be2) - mean2 * padc(g2) * inv2).reshape(1, c_p)
    cc = c2 + csc

    # ---------------- pass 3: BN2 + shortcut BN + add + ReLU ----------------
    out = _pass3(y2.reshape(n * lp, c_p), y1sc.reshape(n * lp, 2 * c_p),
                 a2, asc, cc, rows=n * lp, tm=tl, c_p=c_p)
    out = out.reshape(n, lp, c_p)[:, :l_out, :c_out]
    return jnp.transpose(out, (0, 2, 1))              # back to NCL


# ----------------------------- pure-JAX reference ----------------------------

def _conv1d_ref(x_ncl, w, b, stride, pad):
    y = lax.conv_general_dilated(
        x_ncl, w, window_strides=(stride,), padding=[(pad, pad)],
        dimension_numbers=("NCH", "OIH", "NCH"))
    return y + b[None, :, None]


def _bn_ref(y_ncl, g, be):
    m = jnp.mean(y_ncl, axis=(0, 2), keepdims=True)
    v = jnp.mean((y_ncl - m) ** 2, axis=(0, 2), keepdims=True)
    return (y_ncl - m) * lax.rsqrt(v + EPS) * g[None, :, None] + be[None, :, None]


def residual_block_1d_ref(x_ncl, params, stride):
    (w1, b1, g1, be1, w2, b2, g2, be2, wsc, bsc, gsc, besc) = params
    out = jnp.maximum(_bn_ref(_conv1d_ref(x_ncl, w1, b1, stride, 1), g1, be1), 0.0)
    out = _bn_ref(_conv1d_ref(out, w2, b2, 1, 1), g2, be2)
    sc = _bn_ref(_conv1d_ref(x_ncl, wsc, bsc, stride, 0), gsc, besc)
    return jnp.maximum(out + sc, 0.0)


# ----------------------------------- main ------------------------------------

def _init_params(key, c_in, c_out):
    ks = jax.random.split(key, 12)
    w1 = 0.1 * jax.random.normal(ks[0], (c_out, c_in, 3), jnp.float32)
    b1 = 0.1 * jax.random.normal(ks[1], (c_out,), jnp.float32)
    g1 = 1.0 + 0.1 * jax.random.normal(ks[2], (c_out,), jnp.float32)
    be1 = 0.1 * jax.random.normal(ks[3], (c_out,), jnp.float32)
    w2 = 0.1 * jax.random.normal(ks[4], (c_out, c_out, 3), jnp.float32)
    b2 = 0.1 * jax.random.normal(ks[5], (c_out,), jnp.float32)
    g2 = 1.0 + 0.1 * jax.random.normal(ks[6], (c_out,), jnp.float32)
    be2 = 0.1 * jax.random.normal(ks[7], (c_out,), jnp.float32)
    wsc = 0.1 * jax.random.normal(ks[8], (c_out, c_in, 1), jnp.float32)
    bsc = 0.1 * jax.random.normal(ks[9], (c_out,), jnp.float32)
    gsc = 1.0 + 0.1 * jax.random.normal(ks[10], (c_out,), jnp.float32)
    besc = 0.1 * jax.random.normal(ks[11], (c_out,), jnp.float32)
    return (w1, b1, g1, be1, w2, b2, g2, be2, wsc, bsc, gsc, besc)


if __name__ == "__main__":
    N, C_IN, C_OUT, L, STRIDE = 2, 4, 8, 16, 2

    key = jax.random.PRNGKey(0)
    kx, kp = jax.random.split(key)
    x = jax.random.normal(kx, (N, C_IN, L), jnp.float32)      # NCL, like PyTorch
    params = _init_params(kp, C_IN, C_OUT)

    fwd = jax.jit(functools.partial(residual_block_1d, stride=STRIDE))
    out = jax.block_until_ready(fwd(x, params))

    ref = residual_block_1d_ref(x, params, STRIDE)
    assert out.shape == (N, C_OUT, L // STRIDE), out.shape
    # bf16 matmul operands (f32 accumulation) -> slightly looser tolerance.
    err = float(jnp.max(jnp.abs(out - ref)))
    assert jnp.allclose(out, ref, atol=2e-2, rtol=2e-2), err

    print("KERNEL_OK")
</pallas_src>

<mosaic_0001>
module attributes {stable_mosaic.version = 11 : i64} {
  func.func @_pass1_kernel(%arg0: i32, %arg1: i32, %arg2: memref<1x16x384xbf16, #tpu.memory_space<vmem>>, %arg3: memref<384x256xbf16, #tpu.memory_space<vmem>>, %arg4: memref<1x256xf32, #tpu.memory_space<vmem>>, %arg5: memref<1x16x256xf32, #tpu.memory_space<vmem>>, %arg6: memref<1x2x256xf32, #tpu.memory_space<vmem>>) attributes {dimension_semantics = [#tpu.dimension_semantics<parallel>, #tpu.dimension_semantics<parallel>], iteration_bounds = array<i64: 2, 1>, scalar_prefetch = 0 : i64, scratch_operands = 0 : i64, tpu.core_type = #tpu.core_type<tc>, window_params = [{transform_indices = @transform_0, window_bounds = array<i64: 1, 16, 384>}, {pipeline_mode = #tpu.pipeline_mode<synchronous>, transform_indices = @transform_1, window_bounds = array<i64: 384, 256>}, {pipeline_mode = #tpu.pipeline_mode<synchronous>, transform_indices = @transform_2, window_bounds = array<i64: 1, 256>}, {transform_indices = @transform_3, window_bounds = array<i64: 1, 16, 256>}, {transform_indices = @transform_4, window_bounds = array<i64: 1, 2, 256>}]} {
    %c0 = arith.constant 0 : index
    %c0_0 = arith.constant 0 : index
    %c0_1 = arith.constant 0 : index
    %0 = vector.load %arg2[%c0, %c0_0, %c0_1] : memref<1x16x384xbf16, #tpu.memory_space<vmem>>, vector<1x16x384xbf16>
    %1 = vector.shape_cast %0 : vector<1x16x384xbf16> to vector<16x384xbf16>
    %c0_2 = arith.constant 0 : index
    %c0_3 = arith.constant 0 : index
    %2 = vector.load %arg3[%c0_2, %c0_3] : memref<384x256xbf16, #tpu.memory_space<vmem>>, vector<384x256xbf16>
    %cst = arith.constant dense<0.000000e+00> : vector<16x256xf32>
    %3 = tpu.matmul %1, %2, %cst {dimension_numbers = #tpu.dot_dimension_numbers<[1], [0], [0], [1], [0, 0, 1, 1], [], []>} : vector<16x384xbf16>, vector<384x256xbf16>, vector<16x256xf32> -> vector<16x256xf32>
    %c0_4 = arith.constant 0 : index
    %c0_5 = arith.constant 0 : index
    %4 = vector.load %arg4[%c0_4, %c0_5] : memref<1x256xf32, #tpu.memory_space<vmem>>, vector<1x256xf32>
    %5 = vector.broadcast %4 : vector<1x256xf32> to vector<16x256xf32>
    %6 = arith.addf %3, %5 : vector<16x256xf32>
    %c0_6 = arith.constant 0 : index
    %c0_7 = arith.constant 0 : index
    %c0_8 = arith.constant 0 : index
    %7 = vector.load %arg5[%c0_6, %c0_7, %c0_8] : memref<1x16x256xf32, #tpu.memory_space<vmem>>, vector<1x16x256xf32>
    %8 = vector.shape_cast %7 : vector<1x16x256xf32> to vector<16x256xf32>
    %9 = vector.shape_cast %6 : vector<16x256xf32> to vector<1x16x256xf32>
    tpu.vector_store %arg5[%c0_6, %c0_7, %c0_8], %9 {strides = array<i32>} : memref<1x16x256xf32, #tpu.memory_space<vmem>>, vector<1x16x256xf32>,
    %c16_i32 = arith.constant 16 : i32
    %10 = arith.muli %arg1, %c16_i32 : i32
    %11 = tpu.iota {dimensions = array<i32: 0>} : vector<16x1xi32>
    %12 = vector.broadcast %10 : i32 to vector<16x1xi32>
    %13 = arith.addi %12, %11 : vector<16x1xi32>
    %c8_i32 = arith.constant 8 : i32
    %14 = vector.broadcast %c8_i32 : i32 to vector<16x1xi32>
    %15 = arith.cmpi slt, %13, %14 : vector<16x1xi32>
    %cst_9 = arith.constant 0.000000e+00 : f32
    %16 = vector.shape_cast %15 : vector<16x1xi1> to vector<16x1xi1>
    %17 = vector.broadcast %16 : vector<16x1xi1> to vector<16x256xi1>
    %18 = vector.broadcast %cst_9 : f32 to vector<16x256xf32>
    %19 = arith.select %17, %6, %18 : vector<16x256xi1>, vector<16x256xf32>
    %cst_10 = arith.constant dense<0.000000e+00> : vector<256xf32>
    %20 = vector.multi_reduction <add>, %19, %cst_10 [0] : vector<16x256xf32> to vector<256xf32>
    %21 = vector.shape_cast %20 : vector<256xf32> to vector<1x256xf32>
    %22 = arith.mulf %19, %19 : vector<16x256xf32>
    %cst_11 = arith.constant dense<0.000000e+00> : vector<256xf32>
    %23 = vector.multi_reduction <add>, %22, %cst_11 [0] : vector<16x256xf32> to vector<256xf32>
    %24 = vector.shape_cast %23 : vector<256xf32> to vector<1x256xf32>
    %25 = tpu.concatenate %21, %24 in 0 : vector<1x256xf32>, vector<1x256xf32> -> vector<2x256xf32>
    %c0_12 = arith.constant 0 : index
    %c0_13 = arith.constant 0 : index
    %c0_14 = arith.constant 0 : index
    %26 = vector.load %arg6[%c0_12, %c0_13, %c0_14] : memref<1x2x256xf32, #tpu.memory_space<vmem>>, vector<1x2x256xf32>
    %27 = vector.shape_cast %26 : vector<1x2x256xf32> to vector<2x256xf32>
    %28 = vector.shape_cast %25 : vector<2x256xf32> to vector<1x2x256xf32>
    tpu.vector_store %arg6[%c0_12, %c0_13, %c0_14], %28 {strides = array<i32>} : memref<1x2x256xf32, #tpu.memory_space<vmem>>, vector<1x2x256xf32>,
    return
  }
  func.func @transform_0(%arg0: i32, %arg1: i32) -> (i32, i32, i32) {
    %c0_i32 = arith.constant 0 : i32
    %c0_i32_0 = arith.constant 0 : i32
    return %arg0, %arg1, %c0_i32 : i32, i32, i32
  }
  func.func @transform_1(%arg0: i32, %arg1: i32) -> (i32, i32) {
    %c0_i32 = arith.constant 0 : i32
    %c0_i32_0 = arith.constant 0 : i32
    %c0_i32_1 = arith.constant 0 : i32
    return %c0_i32, %c0_i32_0 : i32, i32
  }
  func.func @transform_2(%arg0: i32, %arg1: i32) -> (i32, i32) {
    %c0_i32 = arith.constant 0 : i32
    %c0_i32_0 = arith.constant 0 : i32
    %c0_i32_1 = arith.constant 0 : i32
    return %c0_i32, %c0_i32_0 : i32, i32
  }
  func.func @transform_3(%arg0: i32, %arg1: i32) -> (i32, i32, i32) {
    %c0_i32 = arith.constant 0 : i32
    %c0_i32_0 = arith.constant 0 : i32
    return %arg0, %arg1, %c0_i32 : i32, i32, i32
  }
  func.func @transform_4(%arg0: i32, %arg1: i32) -> (i32, i32, i32) {
    %c1_i32 = arith.constant 1 : i32
    %0 = arith.muli %arg0, %c1_i32 : i32
    %1 = arith.addi %0, %arg1 : i32
    %c0_i32 = arith.constant 0 : i32
    %c0_i32_0 = arith.constant 0 : i32
    %c0_i32_1 = arith.constant 0 : i32
    return %1, %c0_i32, %c0_i32_0 : i32, i32, i32
  }
}

module attributes {stable_mosaic.version = 11 : i64} {
  func.func @_pass2_kernel(%arg0: i32, %arg1: memref<1x16x128xf32, #tpu.memory_space<vmem>>, %arg2: memref<1x128xf32, #tpu.memory_space<vmem>>, %arg3: memref<1x128xf32, #tpu.memory_space<vmem>>, %arg4: memref<128x384xbf16, #tpu.memory_space<vmem>>, %arg5: memref<1x128xf32, #tpu.memory_space<vmem>>, %arg6: memref<1x16x128xf32, #tpu.memory_space<vmem>>, %arg7: memref<1x2x128xf32, #tpu.memory_space<vmem>>) attributes {dimension_semantics = [#tpu.dimension_semantics<parallel>], iteration_bounds = array<i64: 2>, scalar_prefetch = 0 : i64, scratch_operands = 0 : i64, tpu.core_type = #tpu.core_type<tc>, window_params = [{transform_indices = @transform_0, window_bounds = array<i64: 1, 16, 128>}, {pipeline_mode = #tpu.pipeline_mode<synchronous>, transform_indices = @transform_1, window_bounds = array<i64: 1, 128>}, {pipeline_mode = #tpu.pipeline_mode<synchronous>, transform_indices = @transform_2, window_bounds = array<i64: 1, 128>}, {pipeline_mode = #tpu.pipeline_mode<synchronous>, transform_indices = @transform_3, window_bounds = array<i64: 128, 384>}, {pipeline_mode = #tpu.pipeline_mode<synchronous>, transform_indices = @transform_4, window_bounds = array<i64: 1, 128>}, {transform_indices = @transform_5, window_bounds = array<i64: 1, 16, 128>}, {transform_indices = @transform_6, window_bounds = array<i64: 1, 2, 128>}]} {
    %c0 = arith.constant 0 : index
    %c0_0 = arith.constant 0 : index
    %c0_1 = arith.constant 0 : index
    %0 = vector.load %arg1[%c0, %c0_0, %c0_1] : memref<1x16x128xf32, #tpu.memory_space<vmem>>, vector<1x16x128xf32>
    %1 = vector.shape_cast %0 : vector<1x16x128xf32> to vector<16x128xf32>
    %c0_2 = arith.constant 0 : index
    %c0_3 = arith.constant 0 : index
    %2 = vector.load %arg2[%c0_2, %c0_3] : memref<1x128xf32, #tpu.memory_space<vmem>>, vector<1x128xf32>
    %3 = vector.broadcast %2 : vector<1x128xf32> to vector<16x128xf32>
    %4 = arith.mulf %1, %3 : vector<16x128xf32>
    %c0_4 = arith.constant 0 : index
    %c0_5 = arith.constant 0 : index
    %5 = vector.load %arg3[%c0_4, %c0_5] : memref<1x128xf32, #tpu.memory_space<vmem>>, vector<1x128xf32>
    %6 = vector.broadcast %5 : vector<1x128xf32> to vector<16x128xf32>
    %7 = arith.addf %4, %6 : vector<16x128xf32>
    %cst = arith.constant 0.000000e+00 : f32
    %8 = vector.broadcast %cst : f32 to vector<16x128xf32>
    %9 = arith.maximumf %7, %8 : vector<16x128xf32>
    %10 = tpu.iota {dimensions = array<i32: 0>} : vector<16x1xi32>
    %c8_i32 = arith.constant 8 : i32
    %11 = vector.broadcast %c8_i32 : i32 to vector<16x1xi32>
    %12 = arith.cmpi slt, %10, %11 : vector<16x1xi32>
    %cst_6 = arith.constant 0.000000e+00 : f32
    %13 = vector.shape_cast %12 : vector<16x1xi1> to vector<16x1xi1>
    %14 = vector.broadcast %13 : vector<16x1xi1> to vector<16x128xi1>
    %15 = vector.broadcast %cst_6 : f32 to vector<16x128xf32>
    %16 = arith.select %14, %9, %15 : vector<16x128xi1>, vector<16x128xf32>
    %17 = arith.truncf %16 : vector<16x128xf32> to vector<16x128xbf16>
    %c0_7 = arith.constant 0 : index
    %c0_8 = arith.constant 0 : index
    %18 = vector.load %arg4[%c0_7, %c0_8] : memref<128x384xbf16, #tpu.memory_space<vmem>>, vector<128x384xbf16>
    %cst_9 = arith.constant dense<0.000000e+00> : vector<16x384xf32>
    %19 = tpu.matmul %17, %18, %cst_9 {dimension_numbers = #tpu.dot_dimension_numbers<[1], [0], [0], [1], [0, 0, 1, 1], [], []>} : vector<16x128xbf16>, vector<128x384xbf16>, vector<16x384xf32> -> vector<16x384xf32>
    %20 = vector.extract_strided_slice %19 {offsets = [0, 0], sizes = [16, 128], strides = [1, 1]} : vector<16x384xf32> to vector<16x128xf32>
    %21 = vector.extract_strided_slice %19 {offsets = [0, 128], sizes = [16, 128], strides = [1, 1]} : vector<16x384xf32> to vector<16x128xf32>
    %22 = vector.extract_strided_slice %19 {offsets = [0, 256], sizes = [16, 128], strides = [1, 1]} : vector<16x384xf32> to vector<16x128xf32>
    %cst_10 = arith.constant 0.000000e+00 : f32
    %23 = vector.broadcast %cst_10 : f32 to vector<1x128xf32>
    %24 = vector.extract_strided_slice %20 {offsets = [0, 0], sizes = [15, 128], strides = [1, 1]} : vector<16x128xf32> to vector<15x128xf32>
    %25 = tpu.concatenate %23, %24 in 0 : vector<1x128xf32>, vector<15x128xf32> -> vector<16x128xf32>
    %26 = vector.extract_strided_slice %22 {offsets = [1, 0], sizes = [15, 128], strides = [1, 1]} : vector<16x128xf32> to vector<15x128xf32>
    %27 = tpu.concatenate %26, %23 in 0 : vector<15x128xf32>, vector<1x128xf32> -> vector<16x128xf32>
    %28 = arith.addf %25, %21 : vector<16x128xf32>
    %29 = arith.addf %28, %27 : vector<16x128xf32>
    %c0_11 = arith.constant 0 : index
    %c0_12 = arith.constant 0 : index
    %30 = vector.load %arg5[%c0_11, %c0_12] : memref<1x128xf32, #tpu.memory_space<vmem>>, vector<1x128xf32>
    %31 = vector.broadcast %30 : vector<1x128xf32> to vector<16x128xf32>
    %32 = arith.addf %29, %31 : vector<16x128xf32>
    %c0_13 = arith.constant 0 : index
    %c0_14 = arith.constant 0 : index
    %c0_15 = arith.constant 0 : index
    %33 = vector.load %arg6[%c0_13, %c0_14, %c0_15] : memref<1x16x128xf32, #tpu.memory_space<vmem>>, vector<1x16x128xf32>
    %34 = vector.shape_cast %33 : vector<1x16x128xf32> to vector<16x128xf32>
    %35 = vector.shape_cast %32 : vector<16x128xf32> to vector<1x16x128xf32>
    tpu.vector_store %arg6[%c0_13, %c0_14, %c0_15], %35 {strides = array<i32>} : memref<1x16x128xf32, #tpu.memory_space<vmem>>, vector<1x16x128xf32>,
    %cst_16 = arith.constant 0.000000e+00 : f32
    %36 = vector.shape_cast %12 : vector<16x1xi1> to vector<16x1xi1>
    %37 = vector.broadcast %36 : vector<16x1xi1> to vector<16x128xi1>
    %38 = vector.broadcast %cst_16 : f32 to vector<16x128xf32>
    %39 = arith.select %37, %32, %38 : vector<16x128xi1>, vector<16x128xf32>
    %cst_17 = arith.constant dense<0.000000e+00> : vector<128xf32>
    %40 = vector.multi_reduction <add>, %39, %cst_17 [0] : vector<16x128xf32> to vector<128xf32>
    %41 = vector.shape_cast %40 : vector<128xf32> to vector<1x128xf32>
    %42 = arith.mulf %39, %39 : vector<16x128xf32>
    %cst_18 = arith.constant dense<0.000000e+00> : vector<128xf32>
    %43 = vector.multi_reduction <add>, %42, %cst_18 [0] : vector<16x128xf32> to vector<128xf32>
    %44 = vector.shape_cast %43 : vector<128xf32> to vector<1x128xf32>
    %45 = tpu.concatenate %41, %44 in 0 : vector<1x128xf32>, vector<1x128xf32> -> vector<2x128xf32>
    %c0_19 = arith.constant 0 : index
    %c0_20 = arith.constant 0 : index
    %c0_21 = arith.constant 0 : index
    %46 = vector.load %arg7[%c0_19, %c0_20, %c0_21] : memref<1x2x128xf32, #tpu.memory_space<vmem>>, vector<1x2x128xf32>
    %47 = vector.shape_cast %46 : vector<1x2x128xf32> to vector<2x128xf32>
    %48 = vector.shape_cast %45 : vector<2x128xf32> to vector<1x2x128xf32>
    tpu.vector_store %arg7[%c0_19, %c0_20, %c0_21], %48 {strides = array<i32>} : memref<1x2x128xf32, #tpu.memory_space<vmem>>, vector<1x2x128xf32>,
    return
  }
  func.func @transform_0(%arg0: i32) -> (i32, i32, i32) {
    %c0_i32 = arith.constant 0 : i32
    %c0_i32_0 = arith.constant 0 : i32
    %c0_i32_1 = arith.constant 0 : i32
    return %arg0, %c0_i32, %c0_i32_0 : i32, i32, i32
  }
  func.func @transform_1(%arg0: i32) -> (i32, i32) {
    %c0_i32 = arith.constant 0 : i32
    %c0_i32_0 = arith.constant 0 : i32
    %c0_i32_1 = arith.constant 0 : i32
    return %c0_i32, %c0_i32_0 : i32, i32
  }
  func.func @transform_2(%arg0: i32) -> (i32, i32) {
    %c0_i32 = arith.constant 0 : i32
    %c0_i32_0 = arith.constant 0 : i32
    %c0_i32_1 = arith.constant 0 : i32
    return %c0_i32, %c0_i32_0 : i32, i32
  }
  func.func @transform_3(%arg0: i32) -> (i32, i32) {
    %c0_i32 = arith.constant 0 : i32
    %c0_i32_0 = arith.constant 0 : i32
    %c0_i32_1 = arith.constant 0 : i32
    return %c0_i32, %c0_i32_0 : i32, i32
  }
  func.func @transform_4(%arg0: i32) -> (i32, i32) {
    %c0_i32 = arith.constant 0 : i32
    %c0_i32_0 = arith.constant 0 : i32
    %c0_i32_1 = arith.constant 0 : i32
    return %c0_i32, %c0_i32_0 : i32, i32
  }
  func.func @transform_5(%arg0: i32) -> (i32, i32, i32) {
    %c0_i32 = arith.constant 0 : i32
    %c0_i32_0 = arith.constant 0 : i32
    %c0_i32_1 = arith.constant 0 : i32
    return %arg0, %c0_i32, %c0_i32_0 : i32, i32, i32
  }
  func.func @transform_6(%arg0: i32) -> (i32, i32, i32) {
    %c0_i32 = arith.constant 0 : i32
    %c0_i32_0 = arith.constant 0 : i32
    %c0_i32_1 = arith.constant 0 : i32
    return %arg0, %c0_i32, %c0_i32_0 : i32, i32, i32
  }
}

module attributes {stable_mosaic.version = 11 : i64} {
  func.func @_pass3_kernel(%arg0: i32, %arg1: memref<16x128xf32, #tpu.memory_space<vmem>>, %arg2: memref<16x128xf32, #tpu.memory_space<vmem>>, %arg3: memref<1x128xf32, #tpu.memory_space<vmem>>, %arg4: memref<1x128xf32, #tpu.memory_space<vmem>>, %arg5: memref<1x128xf32, #tpu.memory_space<vmem>>, %arg6: memref<16x128xf32, #tpu.memory_space<vmem>>) attributes {dimension_semantics = [#tpu.dimension_semantics<parallel>], iteration_bounds = array<i64: 2>, scalar_prefetch = 0 : i64, scratch_operands = 0 : i64, tpu.core_type = #tpu.core_type<tc>, window_params = [{transform_indices = @transform_0, window_bounds = array<i64: 16, 128>}, {transform_indices = @transform_1, window_bounds = array<i64: 16, 128>}, {pipeline_mode = #tpu.pipeline_mode<synchronous>, transform_indices = @transform_2, window_bounds = array<i64: 1, 128>}, {pipeline_mode = #tpu.pipeline_mode<synchronous>, transform_indices = @transform_3, window_bounds = array<i64: 1, 128>}, {pipeline_mode = #tpu.pipeline_mode<synchronous>, transform_indices = @transform_4, window_bounds = array<i64: 1, 128>}, {transform_indices = @transform_5, window_bounds = array<i64: 16, 128>}]} {
    %c0 = arith.constant 0 : index
    %c0_0 = arith.constant 0 : index
    %0 = vector.load %arg1[%c0, %c0_0] : memref<16x128xf32, #tpu.memory_space<vmem>>, vector<16x128xf32>
    %c0_1 = arith.constant 0 : index
    %c0_2 = arith.constant 0 : index
    %1 = vector.load %arg3[%c0_1, %c0_2] : memref<1x128xf32, #tpu.memory_space<vmem>>, vector<1x128xf32>
    %2 = vector.broadcast %1 : vector<1x128xf32> to vector<16x128xf32>
    %3 = arith.mulf %0, %2 : vector<16x128xf32>
    %c0_3 = arith.constant 0 : index
    %c0_4 = arith.constant 0 : index
    %4 = vector.load %arg2[%c0_3, %c0_4] : memref<16x128xf32, #tpu.memory_space<vmem>>, vector<16x128xf32>
    %c0_5 = arith.constant 0 : index
    %c0_6 = arith.constant 0 : index
    %5 = vector.load %arg4[%c0_5, %c0_6] : memref<1x128xf32, #tpu.memory_space<vmem>>, vector<1x128xf32>
    %6 = vector.broadcast %5 : vector<1x128xf32> to vector<16x128xf32>
    %7 = arith.mulf %4, %6 : vector<16x128xf32>
    %8 = arith.addf %3, %7 : vector<16x128xf32>
    %c0_7 = arith.constant 0 : index
    %c0_8 = arith.constant 0 : index
    %9 = vector.load %arg5[%c0_7, %c0_8] : memref<1x128xf32, #tpu.memory_space<vmem>>, vector<1x128xf32>
    %10 = vector.broadcast %9 : vector<1x128xf32> to vector<16x128xf32>
    %11 = arith.addf %8, %10 : vector<16x128xf32>
    %cst = arith.constant 0.000000e+00 : f32
    %12 = vector.broadcast %cst : f32 to vector<16x128xf32>
    %13 = arith.maximumf %11, %12 : vector<16x128xf32>
    %c0_9 = arith.constant 0 : index
    %c0_10 = arith.constant 0 : index
    %14 = vector.load %arg6[%c0_9, %c0_10] : memref<16x128xf32, #tpu.memory_space<vmem>>, vector<16x128xf32>
    tpu.vector_store %arg6[%c0_9, %c0_10], %13 {strides = array<i32>} : memref<16x128xf32, #tpu.memory_space<vmem>>, vector<16x128xf32>,
    return
  }
  func.func @transform_0(%arg0: i32) -> (i32, i32) {
    %c0_i32 = arith.constant 0 : i32
    %c0_i32_0 = arith.constant 0 : i32
    return %arg0, %c0_i32 : i32, i32
  }
  func.func @transform_1(%arg0: i32) -> (i32, i32) {
    %c1_i32 = arith.constant 1 : i32
    %c0_i32 = arith.constant 0 : i32
    return %arg0, %c1_i32 : i32, i32
  }
  func.func @transform_2(%arg0: i32) -> (i32, i32) {
    %c0_i32 = arith.constant 0 : i32
    %c0_i32_0 = arith.constant 0 : i32
    %c0_i32_1 = arith.constant 0 : i32
    return %c0_i32, %c0_i32_0 : i32, i32
  }
  func.func @transform_3(%arg0: i32) -> (i32, i32) {
    %c0_i32 = arith.constant 0 : i32
    %c0_i32_0 = arith.constant 0 : i32
    %c0_i32_1 = arith.constant 0 : i32
    return %c0_i32, %c0_i32_0 : i32, i32
  }
  func.func @transform_4(%arg0: i32) -> (i32, i32) {
    %c0_i32 = arith.constant 0 : i32
    %c0_i32_0 = arith.constant 0 : i32
    %c0_i32_1 = arith.constant 0 : i32
    return %c0_i32, %c0_i32_0 : i32, i32
  }
  func.func @transform_5(%arg0: i32) -> (i32, i32) {
    %c0_i32 = arith.constant 0 : i32
    %c0_i32_0 = arith.constant 0 : i32
    return %arg0, %c0_i32 : i32, i32
  }
}

</mosaic_0001>

<bundles_post_ra>
// kernel: residual_block_1d.5
= control target key start
LH: loop header
LB: loop body
LE: loop exit
PB: predicated region body
PF: predicated region fallthrough
CT: control target
= control target key end

     0   :  { %s502_s18 = smov 0   ;;  %s504_s19 = smov 0   ;;  %s564_s0 = inlined_call_operand.vmem [shape: f32[32,128], index: 0, kind: input, shape index: {}]   ;;  %s565_s1 = inlined_call_operand.vmem [shape: f32[32,256], index: 1, kind: input, shape index: {}]   ;;  %s566_s2 = inlined_call_operand.vmem [shape: f32[1,128], index: 2, kind: input, shape index: {}]   ;;  %s567_s3 = inlined_call_operand.vmem [shape: f32[1,128], index: 3, kind: input, shape index: {}]   ;;  %s568_s4 = inlined_call_operand.vmem [shape: f32[1,128], index: 4, kind: input, shape index: {}]   ;;  %s569_s5 = inlined_call_operand.vmem [shape: f32[32,128], index: 5, kind: output, shape index: {}]  }
   0x1   :  { %s506_s20 = smov 0  }
   0x2 LB: > { %s403_s21 = sadd.s32 4294967295, %s470_s20   ;;  %s519_s22 = sadd.s32 1, %s470_s20   ;;  %s470_s20 = sphi %s506_s20, %s572_s20   ;;  %s466_s19 = sphi %s504_s19, %s571_s19   ;;  %s462_s18 = sphi %s502_s18, %s570_s18  }
   0x3   : > { %s45_s23 = ssub.s32 %s470_s20, %s519_s22  ;;  %s48_s24 = sadd.s32 1, %s466_s19 }
   0x4   : > { %p46_p0 = scmp.eq.s32.totalorder %s45_s23, 0  ;;  %p55_p1 = scmp.ne.s32.totalorder %s466_s19, %s462_s18 }
   0x5   : > { %p56_p2 = scmp.eq.s32.totalorder %s470_s20, 0  ;;  %p406_p4 = scmp.ge.s32.totalorder %s470_s20, 2 }
   0x6   : > { %s528_s25 = scalar_select %p46_p0, %s466_s19, %s48_s24  }
   0x7   : > { %p57_p3 = por %p56_p2, %p55_p1  ;;  %179 = sbr.rel (%p406_p4) target bundleno = 21 (0x15), region = 28 }
   0xe   : > { %191 = sbr.rel (!%p57_p3) target bundleno = 21 (0x15), region = 36  ;;  %s193_s26 = sand.u32 (%p57_p3), 1, %s466_s19  }
   0xf   : > { %s423_s27 = sshll.u32 (%p57_p3), %s470_s20, 5  ;;  %s407_s28 = sshll.u32 (%p57_p3), %s193_s26, 4 }
  0x10   : > { %s355_s6 = scalar_lea.vmem (%p57_p3), %s565_s1, %s423_s27  ;;  %s195_s7 = scalar_lea.vmem (%p57_p3), [#allocation2], %s407_s28 }
  0x11   : > { %v410_v0 = vld [vmem:[%s355_s6 + $0x8] sm:$0xff] (%p57_p3)  ;;  %v411_v1 = vld [vmem:[%s355_s6 + $0x18] sm:$0xff] (%p57_p3) }
  0x12   : > { %231 = vst [vmem:[%s195_s7] sm:$0xff] (%p57_p3), %v410_v0  ;;  %233 = vst [vmem:[%s195_s7 + $0x8] sm:$0xff] (%p57_p3), %v411_v1 }
  0x15 PF: > { %p412_p5 = scmp.ge.s32.totalorder %s470_s20, 1  ;;  %p238_p6 = scmp.lt.s32.totalorder %s470_s20, 3 }
  0x17   : > { %p239_p7 = pnand %p412_p5, %p238_p6 }
  0x18   : > { %s245_s8 = sand.u32 (!%p239_p7), 1, %s462_s18   ;;  %s414_s9 = sshll.u32 (!%p239_p7), %s403_s21, 1  ;;  %v419_v4 = vld [vmem:[%s567_s3] ss:$0 sm:$0xff] (!%p239_p7) }
  0x19   : > { %242 = sbr.rel (%p239_p7) target bundleno = 45 (0x2d), region = 74  ;;  %s413_s10 = sshll.u32 (!%p239_p7), %s245_s8, 4  ;;  %v418_v5 = vld [vmem:[%s566_s2] ss:$0 sm:$0xff] (!%p239_p7) }
  0x1a   : > { %p278_p8 = scmp.lt.s32.totalorder (!%p239_p7), %s414_s9, 3  ;;  %s247_s11 = scalar_lea.vmem (!%p239_p7), [#allocation2], %s413_s10  ;;  %v420_v12 = vld [vmem:[%s568_s4] ss:$0 sm:$0xff] (!%p239_p7) }
  0x1b   : > { %v301_v2 = vld [vmem:[%s247_s11] sm:$0xff] (!%p239_p7)  ;;  %v302_v3 = vld [vmem:[%s247_s11 + $0x8] sm:$0xff] (!%p239_p7) }
  0x1c   : > { %v310_v6 = vmul.f32 (!%p239_p7), %v419_v4, %v301_v2  ;;  %v311_v7 = vmul.f32 (!%p239_p7), %v419_v4, %v302_v3 }
  0x20   : > { %s574_s9 = smov (!%p278_p8, %s414_s9), 3 }
  0x21   : > { %s415_s14 = sshll.u32 %s574_s9, 3 }
  0x22   : > { %s281_s18 = scalar_lea.vmem %s564_s0, %s415_s14  ;;  %s288_s27 = scalar_lea.vmem %s569_s5, %s415_s14 }
  0x23   : > { %v290_v8 = vld [vmem:[%s281_s18] sm:$0xff]  ;;  %v291_v9 = vld [vmem:[%s281_s18 + $0x8] sm:$0xff] }
  0x24   : > { %v299_v10 = vmul.f32 %v418_v5, %v290_v8  ;;  %v300_v11 = vmul.f32 %v418_v5, %v291_v9 }
  0x26   : > { %v312_v13 = vadd.f32 %v310_v6, %v299_v10  ;;  %v313_v14 = vadd.f32 %v311_v7, %v300_v11 }
  0x28   : > { %v321_v15 = vadd.f32 %v420_v12, %v312_v13  ;;  %v322_v16 = vadd.f32 %v420_v12, %v313_v14 }
  0x2a   : > { %v323_v17 = vmax.f32 %v321_v15, 0.0  ;;  %v324_v18 = vmax.f32 %v322_v16, 0.0 }
  0x2c   : > { %325 = vst [vmem:[%s288_s27] sm:$0xff] %v323_v17  ;;  %326 = vst [vmem:[%s288_s27 + $0x8] sm:$0xff] %v324_v18 }
  0x2d PF: > { %p12_p9 = scmp.ge.s32.totalorder %s519_s22, 4   ;;  %s570_s18 = smov %s466_s19 }
  0x2e   : > { %s571_s19 = smov %s528_s25  ;;  %s572_s20 = smov %s519_s22 }
  0x2f   :  { %14 = sbr.rel (!%p12_p9) target bundleno = 2 (0x2), region = 116 }

// kernel: residual_block_1d.4
= control target key start
LH: loop header
LB: loop body
LE: loop exit
PB: predicated region body
PF: predicated region fallthrough
CT: control target
= control target key end

     0   :  { %s919_s21 = smov 0   ;;  %s921_s22 = smov 0   ;;  %s1074_s0 = inlined_call_operand.vmem [shape: f32[2,16,256], index: 0, kind: input, shape index: {}]   ;;  %s1075_s1 = inlined_call_operand.vmem [shape: f32[1,128], index: 1, kind: input, shape index: {}]   ;;  %s1076_s2 = inlined_call_operand.vmem [shape: f32[1,128], index: 2, kind: input, shape index: {}]   ;;  %s1077_s3 = inlined_call_operand.vmem [shape: bf16[128,384], index: 3, kind: input, shape index: {}]   ;;  %s1078_s4 = inlined_call_operand.vmem [shape: f32[1,128], index: 4, kind: input, shape index: {}]   ;;  %s1079_s5 = inlined_call_operand.vmem [shape: f32[2,16,128], index: 5, kind: output, shape index: {0}]   ;;  %s1080_s6 = inlined_call_operand.vmem [shape: f32[2,2,128], index: 6, kind: output, shape index: {1}]  }
   0x1   :  { %s923_s23 = smov 0  }
   0x2 LB: > { %s726_s24 = sadd.s32 4294967295, %s879_s23   ;;  %s936_s25 = sadd.s32 1, %s879_s23   ;;  %s879_s23 = sphi %s923_s23, %s1083_s23   ;;  %s875_s22 = sphi %s921_s22, %s1082_s22   ;;  %s871_s21 = sphi %s919_s21, %s1081_s21  }
   0x3   : > { %s21_s26 = ssub.s32 %s879_s23, %s936_s25  ;;  %s24_s27 = sadd.s32 1, %s875_s22 }
   0x4   : > { %p22_p0 = scmp.eq.s32.totalorder %s21_s26, 0  ;;  %p31_p1 = scmp.ne.s32.totalorder %s875_s22, %s871_s21 }
   0x5   : > { %p32_p2 = scmp.eq.s32.totalorder %s879_s23, 0  ;;  %p729_p4 = scmp.ge.s32.totalorder %s879_s23, 2 }
   0x6   : > { %s945_s28 = scalar_select %p22_p0, %s875_s22, %s24_s27  }
   0x7   : > { %p33_p3 = por %p32_p2, %p31_p1  ;;  %205 = sbr.rel (%p729_p4) target bundleno = 21 (0x15), region = 32 }
   0xe   : > { %208 = sbr.rel (!%p33_p3) target bundleno = 21 (0x15), region = 36  ;;  %s210_s29 = sand.u32 (%p33_p3), 1, %s875_s22  }
   0xf   : > { %s767_s30 = sshll.u32 (%p33_p3), %s879_s23, 5  ;;  %s730_s7 = sshll.u32 (%p33_p3), %s210_s29, 4 }
  0x10   : > { %s215_s10 = scalar_lea.vmem (%p33_p3), %s1074_s0, %s767_s30  ;;  %s212_s11 = scalar_lea.vmem (%p33_p3), [#allocation2], %s730_s7 }
  0x11   : > { %v245_v0 = vld [vmem:[%s215_s10] sm:$0xff] (%p33_p3)  ;;  %v247_v1 = vld [vmem:[%s215_s10 + $0x10] sm:$0xff] (%p33_p3) }
  0x12   : > { %246 = vst [vmem:[%s212_s11] sm:$0xff] (%p33_p3), %v245_v0  ;;  %248 = vst [vmem:[%s212_s11 + $0x8] sm:$0xff] (%p33_p3), %v247_v1 }
  0x15 PF: > { %p733_p5 = scmp.ge.s32.totalorder %s879_s23, 1  ;;  %p253_p6 = scmp.lt.s32.totalorder %s879_s23, 3 }
  0x17   : > { %p254_p7 = pnand %p733_p5, %p253_p6 }
  0x18   : > { %v825_v2 = vld [vmem:[%s1077_s3 + $0x4] ss:$12 sps:$4 sm:$0xff] (!%p254_p7)   ;;  %v881_v3 = vmov (!%p254_p7), 0.0   ;;  %v827_v4 = vld [vmem:[%s1077_s3 + $0x8] ss:$12 sps:$4 sm:$0xff] (!%p254_p7)   ;;  %vm882_vm0 = vmmov (!%p254_p7), 0  }
  0x19   : > { %257 = sbr.rel (%p254_p7) target bundleno = 295 (0x127), region = 74  ;;  %778 = vmatprep.subr.bf16.mxu1 (!%p254_p7), %v881_v3  ;;  %794 = vmatprep.mubr.msk.bf16.mxu1 (!%p254_p7), %vm882_vm0, %v881_v3  ;;  %v828_v5 = vld [vmem:[%s1077_s3] ss:$12 sps:$4 sm:$0xff] (!%p254_p7)   ;;  %v829_v6 = vld [vmem:[%s1077_s3 + $0x1c] ss:$12 sps:$4 sm:$0xff] (!%p254_p7)   ;;  %v883_v7 = vmov (!%p254_p7), 0  }
  0x1a   : > { %497 = vmatprep.subr.bf16.mxu0 (!%p254_p7), %v825_v2  ;;  %779 = vmatpush3.bf16.msra.mxu1 (!%p254_p7), %v827_v4  ;;  %v831_v8 = vld [vmem:[%s1077_s3 + $0x20] ss:$12 sps:$4 sm:$0xff] (!%p254_p7)   ;;  %v832_v9 = vld [vmem:[%s1077_s3 + $0x18] ss:$12 sps:$4 sm:$0xff] (!%p254_p7)   ;;  %s260_s10 = sand.u32 (!%p254_p7), 1, %s871_s21   ;;  %p293_p8 = scmp.lt.s32.totalorder (!%p254_p7), %s726_s24, 1 }
  0x1b   : > { %529 = vmatprep.mubr.bf16.mxu0 (!%p254_p7), %v883_v7  ;;  %498 = vmatpush1.bf16.msra.mxu0 (!%p254_p7), %v828_v5  ;;  %v833_v10 = vld [vmem:[%s1077_s3 + $0x34] ss:$12 sps:$4 sm:$0xff] (!%p254_p7)   ;;  %v835_v11 = vld [vmem:[%s1077_s3 + $0x38] ss:$12 sps:$4 sm:$0xff] (!%p254_p7)   ;;  %v836_v12 = vld [vmem:[%s1077_s3 + $0x30] ss:$12 sps:$4 sm:$0xff] (!%p254_p7)  }
  0x1c   : > { %780 = vmatprep.subr.bf16.mxu1 (!%p254_p7), %v881_v3  ;;  %499 = vmatprep.subr.bf16.mxu0 (!%p254_p7), %v829_v6  ;;  %v837_v13 = vld [vmem:[%s1077_s3 + $0x4c] ss:$12 sps:$4 sm:$0xff] (!%p254_p7)   ;;  %v839_v14 = vld [vmem:[%s1077_s3 + $0x50] ss:$12 sps:$4 sm:$0xff] (!%p254_p7)   ;;  %s734_s17 = sshll.u32 (!%p254_p7), %s260_s10, 4  ;;  %vm583_vm1 = vcmask (!%p254_p7), 1040384  }
  0x1d   : > { %v840_v15 = vld [vmem:[%s1077_s3 + $0x48] ss:$12 sps:$4 sm:$0xff] (!%p254_p7)   ;;  %v841_v16 = vld [vmem:[%s1077_s3 + $0x64] ss:$12 sps:$4 sm:$0xff] (!%p254_p7)   ;;  %v844_v18 = vld [vmem:[%s1077_s3 + $0x60] ss:$12 sps:$4 sm:$0xff] (!%p254_p7)  }
  0x1e   : > { %781 = vmatpush3.bf16.msra.mxu1 (!%p254_p7), %v831_v8  ;;  %v843_v17 = vld [vmem:[%s1077_s3 + $0x68] ss:$12 sps:$4 sm:$0xff] (!%p254_p7)   ;;  %s262_s9 = scalar_lea.vmem (!%p254_p7), [#allocation2], %s734_s17  ;;  %v847_v21 = vld [vmem:[%s1077_s3 + $0x80] ss:$12 sps:$4 sm:$0xff] (!%p254_p7)   ;;  %vm592_vm2 = vcmask (!%p254_p7), 1046528  }
  0x1f   : > { %500 = vmatpush1.bf16.msra.mxu0 (!%p254_p7), %v832_v9  ;;  %782 = vmatprep.subr.bf16.mxu1 (!%p254_p7), %v881_v3  ;;  %v845_v19 = vld [vmem:[%s1077_s3 + $0x7c] ss:$12 sps:$4 sm:$0xff] (!%p254_p7)   ;;  %v303_v20 = vld [vmem:[%s262_s9] sm:$0xff] (!%p254_p7)  ;;  %v853_v30 = vld [vmem:[%s1077_s3 + $0xac] ss:$12 sps:$4 sm:$0xff] (!%p254_p7)  }
  0x20   : > { %501 = vmatprep.subr.bf16.mxu0 %v833_v10  ;;  %v738_v22 = vld [vmem:[%s1075_s1] ss:$0 sm:$0xff]  ;;  %v848_v24 = vld [vmem:[%s1077_s3 + $0x78] ss:$12 sps:$4 sm:$0xff]   ;;  %v852_v29 = vld [vmem:[%s1077_s3 + $0x90] ss:$12 sps:$4 sm:$0xff]  }
  0x21   : > { %v739_v23 = vld [vmem:[%s1076_s2] ss:$0 sm:$0xff]  ;;  %v312_v25 = vmul.f32 %v738_v22, %v303_v20  ;;  %v851_v28 = vld [vmem:[%s1077_s3 + $0x98] ss:$12 sps:$4 sm:$0xff]   ;;  %v855_v32 = vld [vmem:[%s1077_s3 + $0xb0] ss:$12 sps:$4 sm:$0xff]  }
  0x22   : > { %783 = vmatpush3.bf16.msra.mxu1 %v835_v11  ;;  %v849_v26 = vld [vmem:[%s1077_s3 + $0x94] ss:$12 sps:$4 sm:$0xff]   ;;  %s1085_s24 = smov (!%p293_p8, %s726_s24), 1 }
  0x23   : > { %502 = vmatpush1.bf16.msra.mxu0 %v836_v12  ;;  %784 = vmatprep.subr.bf16.mxu1 %v881_v3  ;;  %v321_v27 = vadd.f32 %v739_v23, %v312_v25  ;;  %v856_v33 = vld [vmem:[%s1077_s3 + $0xa8] ss:$12 sps:$4 sm:$0xff]   ;;  %s768_s11 = sshll.u32 %s1085_s24, 4  ;;  %v764_v51 = vld [vmem:[%s1078_s4] ss:$0 sm:$0xff]  ;;  %s737_s16 = sshll.u32 %s1085_s24, 1 }
  0x24   : > { %503 = vmatprep.subr.bf16.mxu0 %v837_v13  ;;  %s297_s15 = scalar_lea.vmem %s1079_s5, %s768_s11  ;;  %s301_s18 = scalar_lea.vmem %s1080_s6, %s737_s16 }
  0x25   : > { %v323_v31 = vmax.f32 %v321_v27, 0.0 }
  0x26   : > { %785 = vmatpush3.bf16.msra.mxu1 %v839_v14 }
  0x27   : > { %504 = vmatpush1.bf16.msra.mxu0 %v840_v15  ;;  %786 = vmatprep.subr.bf16.mxu1 %v881_v3  ;;  %v336_v34 = vpack.c.bf16 %v881_v3, %v323_v31 }
  0x28   : > { %505 = vmatprep.subr.bf16.mxu0 %v841_v16 }
  0x2a   : > { %787 = vmatpush3.bf16.msra.mxu1 %v843_v17 }
  0x2b   : > { %506 = vmatpush1.bf16.msra.mxu0 %v844_v18  ;;  %788 = vmatprep.subr.bf16.mxu1 %v881_v3 }
  0x2c   : > { %507 = vmatprep.subr.bf16.mxu0 %v845_v19 }
  0x2e   : > { %789 = vmatpush3.bf16.msra.mxu1 %v847_v21 }
  0x2f   : > { %508 = vmatpush1.bf16.msra.mxu0 %v848_v24  ;;  %790 = vmatprep.subr.bf16.mxu1 %v881_v3 }
  0x30   : > { %509 = vmatprep.subr.bf16.mxu0 %v849_v26 }
  0x32   : > { %791 = vmatpush3.bf16.msra.mxu1 %v851_v28 }
  0x33   : > { %510 = vmatpush1.bf16.msra.mxu0 %v852_v29  ;;  %792 = vmatprep.subr.bf16.mxu1 %v881_v3 }
  0x34   : > { %511 = vmatprep.subr.bf16.mxu0 %v853_v30 }
  0x36   : > { %793 = vmatpush3.bf16.msra.mxu1 %v855_v32 }
  0x37   : > { %512 = vmatpush1.bf16.msra.mxu0 %v856_v33 }
  0x39   : > { %795 = vmatmul.mubr.bf16.vlgmr.msra.gmra.mrb[0].mxu1 %v336_v34 }
  0x3a   : > { %530 = vmatmul.mubr.bf16.vlgmr.msra.gmra.mrb[0].mxu0 %v336_v34 }
 0x10c   : > { %v574_v35 = vpop.f32.mrb[0].mxu1 }
 0x10d   : > { %v593_v36 = vrot.slane %v574_v35, 1  ;;  %v531_v37 = vpop.f32.mrb[0].mxu0  ;;  %v796_v38 = vpop.f32.mrb[1].mxu1 }
 0x10e   : > { %v584_v39 = vrot.slane %v531_v37, 7  ;;  %v533_v40 = vpop.f32.mrb[1].mxu0  ;;  %v577_v41 = vpop.f32.mrb[2].mxu1 }
 0x10f   : > { %v594_v42 = vrot.slane %v577_v41, 1  ;;  %v535_v43 = vpop.f32.mrb[2].mxu0  ;;  %v797_v44 = vpop.f32.mrb[3].mxu1 }
 0x110   : > { %v589_v45 = vsel %vm583_vm1, 0.0, %v584_v39  ;;  %v585_v46 = vrot.slane %v535_v43, 7  ;;  %v537_v47 = vpop.f32.mrb[3].mxu0 }
 0x111   : > { %v599_v48 = vadd.f32 %v589_v45, %v533_v40  ;;  %v595_v49 = vsel %vm592_vm2, %v593_v36, %v594_v42  ;;  %v598_v54 = vsel %vm592_vm2, %v594_v42, 0.0 }
 0x112   : > { %v586_v50 = vsel %vm583_vm1, %v584_v39, %v585_v46 }
 0x113   : > { %v601_v52 = vadd.f32 %v599_v48, %v595_v49  ;;  %v600_v53 = vadd.f32 %v586_v50, %v537_v47 }
 0x115   : > { %v602_v55 = vadd.f32 %v600_v53, %v598_v54  ;;  %v610_v56 = vadd.f32 %v764_v51, %v601_v52 }
 0x117   : > { %v611_v57 = vadd.f32 %v764_v51, %v602_v55  ;;  %612 = vst [vmem:[%s297_s15] sm:$0xff] %v610_v56  ;;  %v617_v58 = vrot.slane %v610_v56, 4  ;;  %v623_v59 = vmul.f32 %v610_v56, %v610_v56 }
 0x119   : > { %613 = vst [vmem:[%s297_s15 + $0x8] sm:$0xff] %v611_v57  ;;  %v618_v60 = vadd.f32 %v617_v58, %v610_v56  ;;  %v626_v61 = vrot.slane %v623_v59, 4 }
 0x11b   : > { %v619_v62 = vrot.slane %v618_v60, 2  ;;  %v627_v63 = vadd.f32 %v626_v61, %v623_v59 }
 0x11d   : > { %v620_v0 = vadd.f32 %v619_v62, %v618_v60  ;;  %v628_v1 = vrot.slane %v627_v63, 2 }
 0x11f   : > { %v621_v2 = vrot.slane %v620_v0, 1  ;;  %v629_v3 = vadd.f32 %v628_v1, %v627_v63 }
 0x121   : > { %v630_v4 = vrot.slane %v629_v3, 1  ;;  %v622_v5 = vadd.f32 %v621_v2, %v620_v0 }
 0x123   : > { %v631_v6 = vadd.f32 %v630_v4, %v629_v3 }
 0x125   : > { %v632_v7 = vsel %vm583_vm1, %v622_v5, %v631_v6 }
 0x126   : > { %633 = vst [vmem:[%s301_s18] sm:$0x3] %v632_v7 }
 0x127 PF: > { %p14_p9 = scmp.ge.s32.totalorder %s936_s25, 4   ;;  %s1081_s21 = smov %s875_s22 }
 0x128   : > { %s1082_s22 = smov %s945_s28  ;;  %s1083_s23 = smov %s936_s25 }
 0x129   :  { %16 = sbr.rel (!%p14_p9) target bundleno = 2 (0x2), region = 125 }

// kernel: residual_block_1d.3
= control target key start
LH: loop header
LB: loop body
LE: loop exit
PB: predicated region body
PF: predicated region fallthrough
CT: control target
= control target key end

     0   :  { %s1093_s15 = smov 0   ;;  %s1095_s16 = smov 0   ;;  %s1290_s0 = inlined_call_operand.vmem [shape: bf16[2,16,384], index: 0, kind: input, shape index: {}]   ;;  %s1291_s1 = inlined_call_operand.vmem [shape: bf16[384,256], index: 1, kind: input, shape index: {}]   ;;  %s1292_s2 = inlined_call_operand.vmem [shape: f32[1,256], index: 2, kind: input, shape index: {}]   ;;  %s1293_s3 = inlined_call_operand.vmem [shape: f32[2,16,256], index: 3, kind: output, shape index: {0}]   ;;  %s1294_s4 = inlined_call_operand.vmem [shape: f32[2,2,256], index: 4, kind: output, shape index: {1}]  }
   0x1   :  { %s1097_s17 = smov 0  }
   0x2 LB: > { %s27_s18 = sadd.s32 1, %s1061_s16  ;;  %p871_p0 = scmp.ge.s32.totalorder %s1065_s17, 1  ;;  %s1065_s17 = sphi %s1097_s17, %s15_s17   ;;  %s1061_s16 = sphi %s1095_s16, %s1296_s16   ;;  %s1057_s15 = sphi %s1093_s15, %s1295_s15  }
   0x3   : > { %p29_p1 = scmp.ge.s32.totalorder %s27_s18, 2  ;;  %p189_p2 = scmp.lt.s32.totalorder %s1065_s17, 3 }
   0x5   : > { %s1298_s18 = smov (%p29_p1, %s27_s18), 0  ;;  %p190_p3 = pnand %p871_p0, %p189_p2 }
   0x6   : > { %v967_v0 = vld [vmem:[%s1291_s1 + $0x4] ss:$8 sps:$4 sm:$0xff] (!%p190_p3)   ;;  %v969_v1 = vld [vmem:[%s1291_s1] ss:$8 sps:$4 sm:$0xff] (!%p190_p3)   ;;  %v1067_v2 = vmov (!%p190_p3), 0   ;;  %p232_p4 = scmp.lt.s32.totalorder (!%p190_p3), %s1057_s15, 1  ;;  %v315_v56 = vlaneseq (!%p190_p3) }
   0x7   : > { %193 = sbr.rel (%p190_p3) target bundleno = 306 (0x132), region = 32  ;;  %656 = vmatprep.mubr.bf16.mxu0 (!%p190_p3), %v1067_v2  ;;  %581 = vmatprep.subr.bf16.mxu1 (!%p190_p3), %v967_v0  ;;  %v970_v3 = vld [vmem:[%s1291_s1 + $0x14] ss:$8 sps:$4 sm:$0xff] (!%p190_p3)   ;;  %v972_v4 = vld [vmem:[%s1291_s1 + $0x10] ss:$8 sps:$4 sm:$0xff] (!%p190_p3)   ;;  %vm720_vm0 = vcmask (!%p190_p3), 1040384  }
   0x8   : > { %582 = vmatpush1.bf16.msra.mxu1 (!%p190_p3), %v969_v1  ;;  %v973_v5 = vld [vmem:[%s1291_s1 + $0x24] ss:$8 sps:$4 sm:$0xff] (!%p190_p3)   ;;  %v975_v6 = vld [vmem:[%s1291_s1 + $0x20] ss:$8 sps:$4 sm:$0xff] (!%p190_p3)   ;;  %v976_v7 = vld [vmem:[%s1291_s1 + $0x34] ss:$8 sps:$4 sm:$0xff] (!%p190_p3)  }
   0x9   : > { %583 = vmatprep.subr.bf16.mxu1 (!%p190_p3), %v970_v3  ;;  %v978_v8 = vld [vmem:[%s1291_s1 + $0x30] ss:$8 sps:$4 sm:$0xff] (!%p190_p3)   ;;  %v991_v9 = vld [vmem:[%s1291_s1 + $0x104] ss:$8 sps:$4 sm:$0xff] (!%p190_p3)   ;;  %v995_v11 = vld [vmem:[%s1291_s1 + $0x100] ss:$8 sps:$4 sm:$0xff] (!%p190_p3)  }
   0xa   : > { %v979_v10 = vld [vmem:[%s1291_s1 + $0x44] ss:$8 sps:$4 sm:$0xff] (!%p190_p3)   ;;  %624 = vmatprep.subr.bf16.mxu0 (!%p190_p3), %v991_v9  ;;  %v997_v12 = vld [vmem:[%s1291_s1 + $0x114] ss:$8 sps:$4 sm:$0xff] (!%p190_p3)   ;;  %v981_v13 = vld [vmem:[%s1291_s1 + $0x40] ss:$8 sps:$4 sm:$0xff] (!%p190_p3)  }
   0xb   : > { %625 = vmatpush1.bf16.msra.mxu0 (!%p190_p3), %v995_v11  ;;  %v982_v14 = vld [vmem:[%s1291_s1 + $0x54] ss:$8 sps:$4 sm:$0xff] (!%p190_p3)   ;;  %v1001_v15 = vld [vmem:[%s1291_s1 + $0x110] ss:$8 sps:$4 sm:$0xff] (!%p190_p3)   ;;  %v1003_v16 = vld [vmem:[%s1291_s1 + $0x124] ss:$8 sps:$4 sm:$0xff] (!%p190_p3)  }
   0xc   : > { %584 = vmatpush1.bf16.msra.mxu1 (!%p190_p3), %v972_v4  ;;  %626 = vmatprep.subr.bf16.mxu0 (!%p190_p3), %v997_v12  ;;  %v984_v17 = vld [vmem:[%s1291_s1 + $0x50] ss:$8 sps:$4 sm:$0xff] (!%p190_p3)   ;;  %v1007_v18 = vld [vmem:[%s1291_s1 + $0x120] ss:$8 sps:$4 sm:$0xff] (!%p190_p3)   ;;  %v1009_v19 = vld [vmem:[%s1291_s1 + $0x134] ss:$8 sps:$4 sm:$0xff] (!%p190_p3)  }
   0xd   : > { %585 = vmatprep.subr.bf16.mxu1 (!%p190_p3), %v973_v5  ;;  %v985_v20 = vld [vmem:[%s1291_s1 + $0x64] ss:$8 sps:$4 sm:$0xff] (!%p190_p3)   ;;  %v1013_v21 = vld [vmem:[%s1291_s1 + $0x130] ss:$8 sps:$4 sm:$0xff] (!%p190_p3)   ;;  %v987_v22 = vld [vmem:[%s1291_s1 + $0x60] ss:$8 sps:$4 sm:$0xff] (!%p190_p3)  }
   0xe   : > { %s1300_s15 = smov (!%p232_p4, %s1057_s15), 1  ;;  %v1015_v23 = vld [vmem:[%s1291_s1 + $0x144] ss:$8 sps:$4 sm:$0xff]   ;;  %v988_v24 = vld [vmem:[%s1291_s1 + $0x74] ss:$8 sps:$4 sm:$0xff]   ;;  %v316_v57 = vshrl.u32 %v315_v56, 7 }
   0xf   : > { %627 = vmatpush1.bf16.msra.mxu0 %v1001_v15  ;;  %v990_v25 = vld [vmem:[%s1291_s1 + $0x70] ss:$8 sps:$4 sm:$0xff]   ;;  %v1019_v26 = vld [vmem:[%s1291_s1 + $0x140] ss:$8 sps:$4 sm:$0xff]   ;;  %s941_s27 = smul.u32 24, %s1300_s15  ;;  %s931_s8 = sshll.u32 %s1300_s15, 5 }
  0x10   : > { %586 = vmatpush1.bf16.msra.mxu1 %v975_v6  ;;  %628 = vmatprep.subr.bf16.mxu0 %v1003_v16  ;;  %v1021_v27 = vld [vmem:[%s1291_s1 + $0x154] ss:$8 sps:$4 sm:$0xff]   ;;  %v993_v28 = vld [vmem:[%s1291_s1 + $0x84] ss:$8 sps:$4 sm:$0xff]   ;;  %v1025_v29 = vld [vmem:[%s1291_s1 + $0x150] ss:$8 sps:$4 sm:$0xff]   ;;  %s251_s11 = scalar_lea.vmem %s1293_s3, %s931_s8 }
  0x11   : > { %587 = vmatprep.subr.bf16.mxu1 %v976_v7  ;;  %s1208_s10 = scalar_lea.vmem %s1290_s0, %s941_s27  ;;  %v996_v30 = vld [vmem:[%s1291_s1 + $0x80] ss:$8 sps:$4 sm:$0xff]   ;;  %v1027_v31 = vld [vmem:[%s1291_s1 + $0x164] ss:$8 sps:$4 sm:$0xff]   ;;  %v999_v32 = vld [vmem:[%s1291_s1 + $0x94] ss:$8 sps:$4 sm:$0xff]  }
  0x12   : > { %v1041_v33 = vld [vmem:[%s1208_s10 + $0x4] ss:$12 sps:$4 sm:$0xff]   ;;  %v1031_v34 = vld [vmem:[%s1291_s1 + $0x160] ss:$8 sps:$4 sm:$0xff]   ;;  %v1033_v36 = vld [vmem:[%s1291_s1 + $0x174] ss:$8 sps:$4 sm:$0xff]  }
  0x13   : > { %629 = vmatpush1.bf16.msra.mxu0 %v1007_v18  ;;  %v1002_v35 = vld [vmem:[%s1291_s1 + $0x90] ss:$8 sps:$4 sm:$0xff]   ;;  %v1005_v37 = vld [vmem:[%s1291_s1 + $0xa4] ss:$8 sps:$4 sm:$0xff]   ;;  %613 = vmatprep.mubr.bf16.mxu1 %v1041_v33  ;;  %v1008_v39 = vld [vmem:[%s1291_s1 + $0xa0] ss:$8 sps:$4 sm:$0xff]  }
  0x14   : > { %588 = vmatpush1.bf16.msra.mxu1 %v978_v8  ;;  %630 = vmatprep.subr.bf16.mxu0 %v1009_v19  ;;  %v1037_v38 = vld [vmem:[%s1291_s1 + $0x170] ss:$8 sps:$4 sm:$0xff]   ;;  %v1011_v40 = vld [vmem:[%s1291_s1 + $0xb4] ss:$8 sps:$4 sm:$0xff]   ;;  %v1017_v43 = vld [vmem:[%s1291_s1 + $0xc4] ss:$8 sps:$4 sm:$0xff]  }
  0x15   : > { %589 = vmatprep.subr.bf16.mxu1 %v979_v10  ;;  %v1042_v41 = vld [vmem:[%s1208_s10 + $0x8] ss:$12 sps:$4 sm:$0xff]   ;;  %v1014_v42 = vld [vmem:[%s1291_s1 + $0xb0] ss:$8 sps:$4 sm:$0xff]   ;;  %v1029_v47 = vld [vmem:[%s1291_s1 + $0xe4] ss:$8 sps:$4 sm:$0xff]  }
  0x16   : > { %v1020_v44 = vld [vmem:[%s1291_s1 + $0xc0] ss:$8 sps:$4 sm:$0xff]   ;;  %v1023_v45 = vld [vmem:[%s1291_s1 + $0xd4] ss:$8 sps:$4 sm:$0xff]   ;;  %v1026_v46 = vld [vmem:[%s1291_s1 + $0xd0] ss:$8 sps:$4 sm:$0xff]  }
  0x17   : > { %631 = vmatpush1.bf16.msra.mxu0 %v1013_v21  ;;  %v1032_v48 = vld [vmem:[%s1291_s1 + $0xe0] ss:$8 sps:$4 sm:$0xff]   ;;  %v1035_v49 = vld [vmem:[%s1291_s1 + $0xf4] ss:$8 sps:$4 sm:$0xff]   ;;  %v1038_v50 = vld [vmem:[%s1291_s1 + $0xf0] ss:$8 sps:$4 sm:$0xff]  }
  0x18   : > { %590 = vmatpush1.bf16.msra.mxu1 %v981_v13  ;;  %632 = vmatprep.subr.bf16.mxu0 %v1015_v23  ;;  %v1039_v51 = vld [vmem:[%s1208_s10] ss:$12 sps:$4 sm:$0xff]   ;;  %v317_v58 = vsub.s32 0, %v316_v57  ;;  %v321_v60 = vsub.s32 1, %v316_v57  ;;  %s932_s12 = sshll.u32 %s1300_s15, 2 }
  0x19   : > { %591 = vmatprep.subr.bf16.mxu1 %v982_v14  ;;  %v313_v59 = vld [vmem:[%s1292_s2] sm:$0x3]  ;;  %s258_s19 = scalar_lea.vmem %s1294_s4, %s932_s12 }
  0x1a   : > { %v318_v61 = vrot.slane %v313_v59, %v317_v58  ;;  %v322_v62 = vrot.slane %v313_v59, %v321_v60 }
  0x1b   : > { %633 = vmatpush1.bf16.msra.mxu0 %v1019_v26 }
  0x1c   : > { %592 = vmatpush1.bf16.msra.mxu1 %v984_v17  ;;  %634 = vmatprep.subr.bf16.mxu0 %v1021_v27 }
  0x1d   : > { %593 = vmatprep.subr.bf16.mxu1 %v985_v20 }
  0x1f   : > { %635 = vmatpush1.bf16.msra.mxu0 %v1025_v29 }
  0x20   : > { %594 = vmatpush1.bf16.msra.mxu1 %v987_v22  ;;  %636 = vmatprep.subr.bf16.mxu0 %v1027_v31 }
  0x21   : > { %595 = vmatprep.subr.bf16.mxu1 %v988_v24 }
  0x23   : > { %637 = vmatpush1.bf16.msra.mxu0 %v1031_v34 }
  0x24   : > { %596 = vmatpush1.bf16.msra.mxu1 %v990_v25  ;;  %638 = vmatprep.subr.bf16.mxu0 %v1033_v36 }
  0x25   : > { %597 = vmatprep.subr.bf16.mxu1 %v993_v28 }
  0x27   : > { %639 = vmatpush1.bf16.msra.mxu0 %v1037_v38 }
  0x28   : > { %598 = vmatpush1.bf16.msra.mxu1 %v996_v30 }
  0x29   : > { %599 = vmatprep.subr.bf16.mxu1 %v999_v32 }
  0x2a   : > { %657 = vmatmul.mubr.bf16.vlgmr.msra.gmra.mrb[0].mxu0 %v1042_v41 }
  0x2c   : > { %600 = vmatpush1.bf16.msra.mxu1 %v1002_v35 }
  0x2d   : > { %601 = vmatprep.subr.bf16.mxu1 %v1005_v37 }
  0x30   : > { %602 = vmatpush1.bf16.msra.mxu1 %v1008_v39 }
  0x31   : > { %603 = vmatprep.subr.bf16.mxu1 %v1011_v40 }
  0x34   : > { %604 = vmatpush1.bf16.msra.mxu1 %v1014_v42 }
  0x35   : > { %605 = vmatprep.subr.bf16.mxu1 %v1017_v43 }
  0x38   : > { %606 = vmatpush1.bf16.msra.mxu1 %v1020_v44 }
  0x39   : > { %607 = vmatprep.subr.bf16.mxu1 %v1023_v45 }
  0x3c   : > { %608 = vmatpush1.bf16.msra.mxu1 %v1026_v46 }
  0x3d   : > { %609 = vmatprep.subr.bf16.mxu1 %v1029_v47 }
  0x40   : > { %610 = vmatpush1.bf16.msra.mxu1 %v1032_v48 }
  0x41   : > { %611 = vmatprep.subr.bf16.mxu1 %v1035_v49 }
  0x44   : > { %612 = vmatpush1.bf16.msra.mxu1 %v1038_v50 }
  0x47   : > { %614 = vmatmul.mubr.bf16.vlgmr.msra.gmra.mrb[0].mxu1 %v1039_v51 }
  0xfd   : > { %v658_v52 = vpop.f32.mrb[0].mxu0 }
  0xfe   : > { %v660_v53 = vpop.f32.mrb[1].mxu0 }
  0xff   : > { %v662_v54 = vpop.f32.mrb[2].mxu0 }
 0x100   : > { %v664_v55 = vpop.f32.mrb[3].mxu0 }
 0x11a   : > { %v615_v63 = vpop.f32.mrb[0].mxu1 }
 0x11b   : > { %v616_v0 = vadd.f32 %v615_v63, %v318_v61  ;;  %v617_v1 = vpop.f32.mrb[1].mxu1 }
 0x11c   : > { %v618_v2 = vadd.f32 %v617_v1, %v322_v62  ;;  %v619_v3 = vpop.f32.mrb[2].mxu1 }
 0x11d   : > { %v659_v4 = vadd.f32 %v658_v52, %v616_v0  ;;  %v620_v5 = vadd.f32 %v619_v3, %v318_v61  ;;  %v621_v6 = vpop.f32.mrb[3].mxu1 }
 0x11e   : > { %v661_v7 = vadd.f32 %v660_v53, %v618_v2  ;;  %v622_v8 = vadd.f32 %v621_v6, %v322_v62 }
 0x11f   : > { %v689_v9 = vrot.slane %v659_v4, 4  ;;  %v702_v10 = vmul.f32 %v659_v4, %v659_v4  ;;  %v663_v11 = vadd.f32 %v662_v54, %v620_v5  ;;  %667 = vst [vmem:[%s251_s11] sm:$0xff] %v659_v4 }
 0x120   : > { %v696_v12 = vrot.slane %v661_v7, 4  ;;  %v703_v13 = vmul.f32 %v661_v7, %v661_v7  ;;  %668 = vst [vmem:[%s251_s11 + $0x8] sm:$0xff] %v661_v7  ;;  %v665_v14 = vadd.f32 %v664_v55, %v622_v8 }
 0x121   : > { %v690_v15 = vadd.f32 %v689_v9, %v659_v4  ;;  %v707_v16 = vrot.slane %v702_v10, 4  ;;  %669 = vst [vmem:[%s251_s11 + $0x10] sm:$0xff] %v663_v11 }
 0x122   : > { %v697_v17 = vadd.f32 %v696_v12, %v661_v7  ;;  %v714_v18 = vrot.slane %v703_v13, 4  ;;  %670 = vst [vmem:[%s251_s11 + $0x18] sm:$0xff] %v665_v14 }
 0x123   : > { %v691_v19 = vrot.slane %v690_v15, 2  ;;  %v708_v20 = vadd.f32 %v707_v16, %v702_v10 }
 0x124   : > { %v698_v21 = vrot.slane %v697_v17, 2  ;;  %v715_v22 = vadd.f32 %v714_v18, %v703_v13 }
 0x125   : > { %v692_v23 = vadd.f32 %v691_v19, %v690_v15  ;;  %v709_v24 = vrot.slane %v708_v20, 2 }
 0x126   : > { %v699_v25 = vadd.f32 %v698_v21, %v697_v17  ;;  %v716_v26 = vrot.slane %v715_v22, 2 }
 0x127   : > { %v693_v27 = vrot.slane %v692_v23, 1  ;;  %v710_v28 = vadd.f32 %v709_v24, %v708_v20 }
 0x128   : > { %v700_v29 = vrot.slane %v699_v25, 1  ;;  %v717_v30 = vadd.f32 %v716_v26, %v715_v22 }
 0x129   : > { %v711_v31 = vrot.slane %v710_v28, 1  ;;  %v694_v33 = vadd.f32 %v693_v27, %v692_v23 }
 0x12a   : > { %v718_v32 = vrot.slane %v717_v30, 1  ;;  %v701_v35 = vadd.f32 %v700_v29, %v699_v25 }
 0x12b   : > { %v712_v34 = vadd.f32 %v711_v31, %v710_v28 }
 0x12c   : > { %v719_v36 = vadd.f32 %v718_v32, %v717_v30 }
 0x12d   : > { %v721_v37 = vsel %vm720_vm0, %v694_v33, %v712_v34 }
 0x12e   : > { %v722_v38 = vsel %vm720_vm0, %v701_v35, %v719_v36 }
 0x12f   : > { %v725_v39 = vcombine.low %v721_v37, %v722_v38 }
 0x131   : > { %928 = vst.sshfl [vmem:[%s258_s19] sm:$0x33 pattern:$0x76325410] %v725_v39 }
 0x132 PF: > { %s15_s17 = sadd.s32 1, %s1065_s17   ;;  %s1295_s15 = smov %s1061_s16 }
 0x133   : > { %p12_p5 = scmp.ge.s32.totalorder %s15_s17, 4   ;;  %s1296_s16 = smov %s1298_s18 }
 0x135   :  { %14 = sbr.rel (!%p12_p5) target bundleno = 2 (0x2), region = 74 }

</bundles_post_ra>
